<compile_context>
chip_gen: v7x
topology: tpu7x:2x2x1
jax: 0.10.0
libtpu: 0.0.40
codegen_flags: <defaults>
</compile_context>

<pallas_src>
import functools

import jax
import jax.numpy as jnp
from jax.experimental import pallas as pl
from jax.experimental.pallas import tpu as pltpu

LANES = 128
SUBLANES = 8


def _focal_elementwise(x, t, alpha, gamma):
    """Elementwise focal loss in f32. x, t are f32 arrays."""
    # Numerically-stable BCE with logits:
    #   bce = max(x, 0) - x*t + log(1 + exp(-|x|))
    bce = jnp.maximum(x, 0.0) - x * t + jnp.log1p(jnp.exp(-jnp.abs(x)))
    pt = jnp.exp(-bce)
    omp = 1.0 - pt
    g = float(gamma)
    if g == int(g) and 0 <= int(g) <= 8:
        # Integer gamma (default 2.0): pure VPU multiplies, no pow->exp/log.
        gi = int(g)
        if gi == 0:
            w = jnp.ones_like(omp)
        else:
            w = omp
            for _ in range(gi - 1):
                w = w * omp
    else:
        w = omp ** g
    return (alpha * w) * bce


def _focal_sum_kernel(x_ref, t_ref, o_ref, acc_ref, *, alpha, gamma,
                      block_rows, n_valid, needs_mask):
    c = pl.program_id(0)           # split (TensorCore) index
    k = pl.program_id(1)           # block index within the split

    @pl.when(k == 0)
    def _init():
        acc_ref[...] = jnp.zeros_like(acc_ref)

    x = x_ref[...].astype(jnp.float32)
    t = t_ref[...].astype(jnp.float32)
    focal = _focal_elementwise(x, t, alpha, gamma)

    if needs_mask:
        # Mask out lane padding / block overhang using the global element index.
        block_idx = c * pl.num_programs(1) + k
        row_iota = jax.lax.broadcasted_iota(jnp.int32, (block_rows, LANES), 0)
        lane_iota = jax.lax.broadcasted_iota(jnp.int32, (block_rows, LANES), 1)
        gidx = (block_idx * block_rows + row_iota) * LANES + lane_iota
        focal = jnp.where(gidx < n_valid, focal, 0.0)

    # Per-tile VPU partial reduce into an (8,128) vector accumulator; the
    # expensive cross-lane reduction happens once in the wrapper.
    acc_ref[...] += jnp.sum(focal.reshape(-1, SUBLANES, LANES), axis=0)

    @pl.when(k == pl.num_programs(1) - 1)
    def _finalize():
        o_ref[0] = acc_ref[...]


def _focal_map_kernel(x_ref, t_ref, o_ref, *, alpha, gamma):
    x = x_ref[...].astype(jnp.float32)
    t = t_ref[...].astype(jnp.float32)
    o_ref[...] = _focal_elementwise(x, t, alpha, gamma).astype(o_ref.dtype)


def focal_loss(inputs, targets, *, alpha=1.0, gamma=2.0, reduction="mean",
               tile_rows=1024):
    """Pallas focal loss matching the PyTorch FocalLoss module.

    reduction='mean' / 'sum' return a scalar; any other value returns the
    elementwise loss with the same shape as `inputs` (PyTorch 'none' path).
    """
    assert inputs.shape == targets.shape
    n = int(inputs.size)
    orig_shape = inputs.shape
    orig_dtype = inputs.dtype

    # Keep native dtype (bf16 stays bf16); cast to f32 inside the kernel.
    x = inputs.reshape(-1)
    t = targets.reshape(-1)

    # Only pad to a multiple of 128 lanes (at most 127 elements); typical NCHW
    # activation sizes need no copy at all.
    lane_pad = (-n) % LANES
    if lane_pad:
        x = jnp.pad(x, (0, lane_pad))
        t = jnp.pad(t, (0, lane_pad))
    rows = (n + lane_pad) // LANES
    x2 = x.reshape(rows, LANES)
    t2 = t.reshape(rows, LANES)

    tile_rows = max(SUBLANES, (int(tile_rows) // SUBLANES) * SUBLANES)
    rows8 = pl.cdiv(rows, SUBLANES) * SUBLANES
    block_rows = min(tile_rows, rows8)
    num_blocks = pl.cdiv(rows, block_rows)

    if reduction not in ("mean", "sum"):
        out = pl.pallas_call(
            functools.partial(_focal_map_kernel,
                              alpha=float(alpha), gamma=float(gamma)),
            out_shape=jax.ShapeDtypeStruct((rows, LANES), jnp.float32),
            grid_spec=pltpu.PrefetchScalarGridSpec(
                num_scalar_prefetch=0,
                grid=(num_blocks,),
                in_specs=[pl.BlockSpec((block_rows, LANES), lambda i: (i, 0)),
                          pl.BlockSpec((block_rows, LANES), lambda i: (i, 0))],
                out_specs=pl.BlockSpec((block_rows, LANES), lambda i: (i, 0)),
            ),
            compiler_params=pltpu.CompilerParams(
                dimension_semantics=("parallel",)),
        )(x2, t2)
        return out.reshape(-1)[:n].reshape(orig_shape).astype(orig_dtype)

    # --- mean / sum reduction path ---
    # Split the block loop across 2 TensorCores when it divides evenly
    # (v7x megacore); on 1-TC chips the parallel axis just serialises.
    n_splits = 2 if (num_blocks >= 2 and num_blocks % 2 == 0) else 1
    blocks_per_split = num_blocks // n_splits
    covered = num_blocks * block_rows * LANES
    needs_mask = covered != n

    kernel = functools.partial(
        _focal_sum_kernel, alpha=float(alpha), gamma=float(gamma),
        block_rows=block_rows, n_valid=n, needs_mask=needs_mask)

    def in_idx(c, k):
        return (c * blocks_per_split + k, 0)

    partials = pl.pallas_call(
        kernel,
        out_shape=jax.ShapeDtypeStruct((n_splits, SUBLANES, LANES),
                                       jnp.float32),
        grid_spec=pltpu.PrefetchScalarGridSpec(
            num_scalar_prefetch=0,
            grid=(n_splits, blocks_per_split),
            in_specs=[pl.BlockSpec((block_rows, LANES), in_idx),
                      pl.BlockSpec((block_rows, LANES), in_idx)],
            out_specs=pl.BlockSpec((1, SUBLANES, LANES),
                                   lambda c, k: (c, 0, 0)),
            scratch_shapes=[pltpu.VMEM((SUBLANES, LANES), jnp.float32)],
        ),
        compiler_params=pltpu.CompilerParams(
            dimension_semantics=("parallel", "arbitrary")),
    )(x2, t2)

    total = jnp.sum(partials, dtype=jnp.float32)
    if reduction == "mean":
        return total * jnp.float32(1.0 / n)
    return total


def _focal_loss_ref(inputs, targets, alpha=1.0, gamma=2.0, reduction="mean"):
    x = inputs.astype(jnp.float32)
    t = targets.astype(jnp.float32)
    bce = jnp.maximum(x, 0.0) - x * t + jnp.log1p(jnp.exp(-jnp.abs(x)))
    pt = jnp.exp(-bce)
    fl = alpha * (1.0 - pt) ** gamma * bce
    if reduction == "mean":
        return jnp.mean(fl)
    if reduction == "sum":
        return jnp.sum(fl)
    return fl


if __name__ == "__main__":
    key = jax.random.PRNGKey(0)
    k1, k2 = jax.random.split(key)
    # NCHW logits and binary targets, small shapes.
    B, C, H, W = 2, 4, 16, 16
    logits = jax.random.normal(k1, (B, C, H, W), dtype=jnp.float32) * 2.0
    targets = (jax.random.uniform(k2, (B, C, H, W)) > 0.5).astype(jnp.float32)

    out_mean = jax.block_until_ready(
        focal_loss(logits, targets, alpha=1.0, gamma=2.0, reduction="mean"))
    ref_mean = _focal_loss_ref(logits, targets, reduction="mean")
    assert jnp.allclose(out_mean, ref_mean, rtol=1e-5, atol=1e-6), (out_mean, ref_mean)

    out_sum = jax.block_until_ready(
        focal_loss(logits, targets, alpha=1.0, gamma=2.0, reduction="sum"))
    ref_sum = _focal_loss_ref(logits, targets, reduction="sum")
    assert jnp.allclose(out_sum, ref_sum, rtol=1e-5, atol=1e-4), (out_sum, ref_sum)

    out_none = jax.block_until_ready(
        focal_loss(logits, targets, alpha=1.0, gamma=2.0, reduction="none"))
    ref_none = _focal_loss_ref(logits, targets, reduction="none")
    assert jnp.allclose(out_none, ref_none, rtol=1e-5, atol=1e-6)

    # Ragged, non-128-multiple bf16 case exercises the in-kernel mask + native
    # dtype path.
    n_odd = 1000
    x_odd = jax.random.normal(k1, (n_odd,), dtype=jnp.bfloat16)
    t_odd = (jax.random.uniform(k2, (n_odd,)) > 0.5).astype(jnp.bfloat16)
    out_odd = jax.block_until_ready(focal_loss(x_odd, t_odd, reduction="mean"))
    ref_odd = _focal_loss_ref(x_odd, t_odd, reduction="mean")
    assert jnp.allclose(out_odd, ref_odd, rtol=1e-4, atol=1e-5), (out_odd, ref_odd)

    print("KERNEL_OK")
</pallas_src>

<mosaic_0001>
module attributes {stable_mosaic.version = 11 : i64} {
  func.func @_focal_sum_kernel(%arg0: i32, %arg1: i32, %arg2: memref<16x128xf32, #tpu.memory_space<vmem>>, %arg3: memref<16x128xf32, #tpu.memory_space<vmem>>, %arg4: memref<1x8x128xf32, #tpu.memory_space<vmem>>, %arg5: memref<8x128xf32, #tpu.memory_space<vmem>>) attributes {dimension_semantics = [#tpu.dimension_semantics<parallel>, #tpu.dimension_semantics<arbitrary>], iteration_bounds = array<i64: 1, 1>, scalar_prefetch = 0 : i64, scratch_operands = 1 : i64, tpu.core_type = #tpu.core_type<tc>, window_params = [{transform_indices = @transform_0, window_bounds = array<i64: 16, 128>}, {transform_indices = @transform_1, window_bounds = array<i64: 16, 128>}, {transform_indices = @transform_2, window_bounds = array<i64: 1, 8, 128>}]} {
    %c0_i32 = arith.constant 0 : i32
    %0 = arith.cmpi eq, %arg1, %c0_i32 : i32
    %1 = arith.extui %0 : i1 to i32
    %c0_i32_0 = arith.constant 0 : i32
    %2 = arith.cmpi ne, %1, %c0_i32_0 : i32
    scf.if %2 {
      %cst_15 = arith.constant 0.000000e+00 : f32
      %32 = vector.broadcast %cst_15 : f32 to vector<8x128xf32>
      %c0_16 = arith.constant 0 : index
      %c0_17 = arith.constant 0 : index
      %33 = vector.load %arg5[%c0_16, %c0_17] : memref<8x128xf32, #tpu.memory_space<vmem>>, vector<8x128xf32>
      tpu.vector_store %arg5[%c0_16, %c0_17], %32 {strides = array<i32>} : memref<8x128xf32, #tpu.memory_space<vmem>>, vector<8x128xf32>,
    } else {
    }
    %c0 = arith.constant 0 : index
    %c0_1 = arith.constant 0 : index
    %3 = vector.load %arg2[%c0, %c0_1] : memref<16x128xf32, #tpu.memory_space<vmem>>, vector<16x128xf32>
    %c0_2 = arith.constant 0 : index
    %c0_3 = arith.constant 0 : index
    %4 = vector.load %arg3[%c0_2, %c0_3] : memref<16x128xf32, #tpu.memory_space<vmem>>, vector<16x128xf32>
    %cst = arith.constant 0.000000e+00 : f32
    %5 = vector.broadcast %cst : f32 to vector<16x128xf32>
    %6 = arith.maximumf %3, %5 : vector<16x128xf32>
    %7 = arith.mulf %3, %4 : vector<16x128xf32>
    %8 = arith.subf %6, %7 : vector<16x128xf32>
    %9 = math.absf %3 : vector<16x128xf32>
    %cst_4 = arith.constant 0.000000e+00 : f32
    %10 = vector.broadcast %cst_4 : f32 to vector<16x128xf32>
    %11 = arith.subf %10, %9 : vector<16x128xf32>
    %12 = math.exp %11 : vector<16x128xf32>
    %13 = math.log1p %12 : vector<16x128xf32>
    %14 = arith.addf %8, %13 : vector<16x128xf32>
    %cst_5 = arith.constant 0.000000e+00 : f32
    %15 = vector.broadcast %cst_5 : f32 to vector<16x128xf32>
    %16 = arith.subf %15, %14 : vector<16x128xf32>
    %17 = math.exp %16 : vector<16x128xf32>
    %cst_6 = arith.constant 1.000000e+00 : f32
    %18 = vector.broadcast %cst_6 : f32 to vector<16x128xf32>
    %19 = arith.subf %18, %17 : vector<16x128xf32>
    %20 = arith.mulf %19, %19 : vector<16x128xf32>
    %cst_7 = arith.constant 1.000000e+00 : f32
    %21 = vector.broadcast %cst_7 : f32 to vector<16x128xf32>
    %22 = arith.mulf %21, %20 : vector<16x128xf32>
    %23 = arith.mulf %22, %14 : vector<16x128xf32>
    %c0_8 = arith.constant 0 : index
    %c0_9 = arith.constant 0 : index
    %24 = vector.load %arg5[%c0_8, %c0_9] : memref<8x128xf32, #tpu.memory_space<vmem>>, vector<8x128xf32>
    %25 = vector.shape_cast %23 : vector<16x128xf32> to vector<2x8x128xf32>
    %cst_10 = arith.constant dense<0.000000e+00> : vector<8x128xf32>
    %26 = vector.multi_reduction <add>, %25, %cst_10 [0] : vector<2x8x128xf32> to vector<8x128xf32>
    %27 = arith.addf %24, %26 : vector<8x128xf32>
    %c0_11 = arith.constant 0 : index
    %c0_12 = arith.constant 0 : index
    %28 = vector.load %arg5[%c0_11, %c0_12] : memref<8x128xf32, #tpu.memory_space<vmem>>, vector<8x128xf32>
    tpu.vector_store %arg5[%c0_11, %c0_12], %27 {strides = array<i32>} : memref<8x128xf32, #tpu.memory_space<vmem>>, vector<8x128xf32>,
    %c0_i32_13 = arith.constant 0 : i32
    %29 = arith.cmpi eq, %arg1, %c0_i32_13 : i32
    %30 = arith.extui %29 : i1 to i32
    %c0_i32_14 = arith.constant 0 : i32
    %31 = arith.cmpi ne, %30, %c0_i32_14 : i32
    scf.if %31 {
      %c0_15 = arith.constant 0 : index
      %c0_16 = arith.constant 0 : index
      %32 = vector.load %arg5[%c0_15, %c0_16] : memref<8x128xf32, #tpu.memory_space<vmem>>, vector<8x128xf32>
      %c0_17 = arith.constant 0 : index
      %c0_18 = arith.constant 0 : index
      %c0_19 = arith.constant 0 : index
      %33 = vector.load %arg4[%c0_17, %c0_18, %c0_19] : memref<1x8x128xf32, #tpu.memory_space<vmem>>, vector<1x8x128xf32>
      %34 = vector.shape_cast %33 : vector<1x8x128xf32> to vector<8x128xf32>
      %35 = vector.shape_cast %32 : vector<8x128xf32> to vector<1x8x128xf32>
      tpu.vector_store %arg4[%c0_17, %c0_18, %c0_19], %35 {strides = array<i32>} : memref<1x8x128xf32, #tpu.memory_space<vmem>>, vector<1x8x128xf32>,
    } else {
    }
    return
  }
  func.func @transform_0(%arg0: i32, %arg1: i32) -> (i32, i32) {
    %c1_i32 = arith.constant 1 : i32
    %0 = arith.muli %arg0, %c1_i32 : i32
    %1 = arith.addi %0, %arg1 : i32
    %c0_i32 = arith.constant 0 : i32
    %c0_i32_0 = arith.constant 0 : i32
    return %1, %c0_i32 : i32, i32
  }
  func.func @transform_1(%arg0: i32, %arg1: i32) -> (i32, i32) {
    %c1_i32 = arith.constant 1 : i32
    %0 = arith.muli %arg0, %c1_i32 : i32
    %1 = arith.addi %0, %arg1 : i32
    %c0_i32 = arith.constant 0 : i32
    %c0_i32_0 = arith.constant 0 : i32
    return %1, %c0_i32 : i32, i32
  }
  func.func @transform_2(%arg0: i32, %arg1: i32) -> (i32, i32, i32) {
    %c0_i32 = arith.constant 0 : i32
    %c0_i32_0 = arith.constant 0 : i32
    %c0_i32_1 = arith.constant 0 : i32
    return %arg0, %c0_i32, %c0_i32_0 : i32, i32, i32
  }
}

</mosaic_0001>

<bundles_post_ra>
// kernel: tpu_custom_call.1
= control target key start
LH: loop header
LB: loop body
LE: loop exit
PB: predicated region body
PF: predicated region fallthrough
CT: control target
= control target key end

     0   :  { %7 = vsyncpa [#allocation4], 0  ;;  %s277_s0 = inlined_call_operand.hbm [shape: f32[16,128], index: 0, kind: input, shape index: {}]   ;;  %s278_s1 = inlined_call_operand.hbm [shape: f32[16,128], index: 1, kind: input, shape index: {}]   ;;  %s279_s2 = inlined_call_operand.hbm [shape: f32[1,8,128], index: 2, kind: output, shape index: {}]  }
   0x1   :  { %8 = vsyncpa [#allocation7], 0 }
   0x2   :  { %9 = vsyncpa [#allocation5], 0  ;;  %s221_s9 = smov [#allocation3]   ;;  %s149_s13 = scalar_lea.hbm %s277_s0, 256 }
   0x3   :  { %s19_s10 = sshll.u32 %s221_s9, 4  ;;  %p150_p0 = scmp.ne.s32.totalorder %s277_s0, %s149_s13  ;;  %s20_s10 = int_to_ptr.vmem [resolvable:$true] %s19_s10 }
   0x4   :  { %p153_p1 = scmp.lt.u32.totalorder %s149_s13, %s277_s0 }
   0x6   :  { %p155_p2 = pnand %p153_p1, %p150_p0 }
   0x8   :  { %158 = shalt.err (!%p155_p2)
}
   0x9   :  { %s159_s18 = scalar_lea.vmem %s20_s10, 256  ;;  %p164_p4 = scmp.lt.s32.totalorder %s20_s10, %s20_s10 }
   0xa   :  { %p160_p3 = scmp.ne.s32.totalorder %s20_s10, %s159_s18  ;;  %p165_p5 = scmp.lt.s32.totalorder %s159_s18, %s159_s18 }
   0xc   :  { %p166_p6 = por %p165_p5, %p164_p4 }
   0xe   :  { %p167_p7 = pnand %p166_p6, %p160_p3 }
  0x10   :  { %170 = shalt.err (!%p167_p7)
}
  0x11   :  { %s222_s19 = smov 128   ;;  %s223_s20 = smov 8  }
  0x12   :  { %25 = dma.hbm_to_vmem [thread:$0]  %s277_s0, 256, %s20_s10, [#allocation4], %s222_s19, %s222_s19, %s223_s20  }
  0x13   :  { %s224_s23 = smov [#allocation6]   ;;  %s171_s27 = scalar_lea.hbm %s278_s1, 256 }
  0x14   :  { %s35_s24 = sshll.u32 %s224_s23, 4  ;;  %p172_p8 = scmp.ne.s32.totalorder %s278_s1, %s171_s27  ;;  %s36_s24 = int_to_ptr.vmem [resolvable:$true] %s35_s24 }
  0x15   :  { %p175_p9 = scmp.lt.u32.totalorder %s171_s27, %s278_s1 }
  0x17   :  { %p177_p10 = pnand %p175_p9, %p172_p8 }
  0x19   :  { %180 = shalt.err (!%p177_p10)
}
  0x1a   :  { %s181_s4 = scalar_lea.vmem %s36_s24, 256  ;;  %p186_p12 = scmp.lt.s32.totalorder %s36_s24, %s36_s24 }
  0x1b   :  { %p182_p11 = scmp.ne.s32.totalorder %s36_s24, %s181_s4  ;;  %p187_p13 = scmp.lt.s32.totalorder %s181_s4, %s181_s4 }
  0x1d   :  { %p188_p0 = por %p187_p13, %p186_p12 }
  0x1f   :  { %p189_p1 = pnand %p188_p0, %p182_p11 }
  0x21   :  { %192 = shalt.err (!%p189_p1)
}
  0x22   :  { %41 = dma.hbm_to_vmem [thread:$0]  %s278_s1, 256, %s36_s24, [#allocation7], %s222_s19, %s222_s19, %s223_s20  }
  0x23   :  { %215 = dma.done.wait [#allocation4], 256  }
  0x24   :  { %216 = vsyncadd [#allocation4], 4294967040 }
  0x25   :  { %217 = dma.done.wait [#allocation7], 256  }
  0x26   :  { %218 = vsyncadd [#allocation7], 4294967040  ;;  %v57_v0 = vld [vmem:[#allocation3] sm:$0xff]  ;;  %v58_v1 = vld [vmem:[#allocation3 + $0x8] sm:$0xff]  ;;  %s225_s1 = smov [#allocation8]  }
  0x27   :  { %v67_v2 = vand.u32 2147483647, %v57_v0  ;;  %v68_v3 = vand.u32 2147483647, %v58_v1  ;;  %v59_v14 = vld [vmem:[#allocation6] sm:$0xff]  ;;  %v60_v15 = vld [vmem:[#allocation6 + $0x8] sm:$0xff] }
  0x28   :  { %v61_v17 = vmax.f32 %v57_v0, 0.0  ;;  %v63_v18 = vmul.f32 %v59_v14, %v57_v0  ;;  %v62_v21 = vmax.f32 %v58_v1, 0.0  ;;  %v64_v22 = vmul.f32 %v60_v15, %v58_v1  ;;  %s122_s6 = sshll.u32 %s225_s1, 4  ;;  %s123_s6 = int_to_ptr.vmem [resolvable:$true] %s122_s6 }
  0x29   :  { %v69_v4 = vsub.f32 0.0, %v67_v2  ;;  %v70_v5 = vsub.f32 0.0, %v68_v3  ;;  %s193_s7 = scalar_lea.vmem %s123_s6, 128  ;;  %p198_p3 = scmp.lt.s32.totalorder %s123_s6, %s123_s6 }
  0x2a   :  { %v65_v26 = vsub.f32 %v61_v17, %v63_v18  ;;  %v66_v29 = vsub.f32 %v62_v21, %v64_v22  ;;  %p194_p2 = scmp.ne.s32.totalorder %s123_s6, %s193_s7  ;;  %p199_p4 = scmp.lt.s32.totalorder %s193_s7, %s193_s7 }
  0x2b   :  { %v71_v6 = vmul.f32 1.442695, %v69_v4  ;;  %v73_v7 = vmul.f32 1.442695, %v70_v5 }
  0x2c   :  { %p200_p5 = por %p199_p4, %p198_p3 }
  0x2d   :  { %137 = vpow2.f32 %v71_v6 }
  0x2e   :  { %139 = vpow2.f32 %v73_v7  ;;  %p201_p6 = pnand %p200_p5, %p194_p2 }
  0x37   :  { %v138_v8 = vpop.eup %137 }
  0x38   :  { %v140_v9 = vpop.eup %139  ;;  %v75_v10 = vadd.f32 1.0, %v138_v8  ;;  %v78_v12 = vmul.f32 -0.5, %v138_v8  ;;  %v81_v19 = vand.u32 2147483647, %v138_v8 }
  0x39   :  { %v84_v11 = vadd.f32 1.0, %v140_v9  ;;  %v87_v13 = vmul.f32 -0.5, %v140_v9  ;;  %v90_v23 = vand.u32 2147483647, %v140_v9 }
  0x3a   :  { %141 = vlog2.f32 %v75_v10  ;;  %v79_v16 = vadd.f32 1.0, %v78_v12  ;;  %vm82_vm0 = vcmp.lt.f32.partialorder %v81_v19, 0.0004427343 }
  0x3b   :  { %143 = vlog2.f32 %v84_v11  ;;  %v88_v20 = vadd.f32 1.0, %v87_v13  ;;  %vm91_vm1 = vcmp.lt.f32.partialorder %v90_v23, 0.0004427343 }
  0x3c   :  { %v80_v24 = vmul.f32 %v138_v8, %v79_v16 }
  0x3d   :  { %v89_v27 = vmul.f32 %v140_v9, %v88_v20 }
  0x44   :  { %v142_v25 = vpop.eup %141 }
  0x45   :  { %v144_v28 = vpop.eup %143  ;;  %v77_v30 = vmul.f32 0.6931472, %v142_v25 }
  0x46   :  { %v86_v31 = vmul.f32 0.6931472, %v144_v28 }
  0x47   :  { %v83_v32 = vsel %vm82_vm0, %v80_v24, %v77_v30 }
  0x48   :  { %v92_v33 = vsel %vm91_vm1, %v89_v27, %v86_v31  ;;  %v93_v34 = vadd.f32 %v83_v32, %v65_v26 }
  0x49   :  { %v94_v35 = vadd.f32 %v92_v33, %v66_v29 }
  0x4a   :  { %v95_v36 = vsub.f32 0.0, %v93_v34 }
  0x4b   :  { %v96_v37 = vsub.f32 0.0, %v94_v35 }
  0x4c   :  { %v97_v38 = vmul.f32 1.442695, %v95_v36 }
  0x4d   :  { %v99_v39 = vmul.f32 1.442695, %v96_v37 }
  0x4e   :  { %145 = vpow2.f32 %v97_v38 }
  0x4f   :  { %147 = vpow2.f32 %v99_v39 }
  0x58   :  { %v146_v40 = vpop.eup %145 }
  0x59   :  { %v148_v41 = vpop.eup %147  ;;  %v101_v42 = vsub.f32 1.0, %v146_v40 }
  0x5a   :  { %v102_v43 = vsub.f32 1.0, %v148_v41 }
  0x5b   :  { %v103_v44 = vmul.f32 %v101_v42, %v101_v42 }
  0x5c   :  { %v104_v45 = vmul.f32 %v102_v43, %v102_v43 }
  0x5d   :  { %v105_v46 = vmul.f32 %v103_v44, %v93_v34 }
  0x5e   :  { %v106_v47 = vmul.f32 %v104_v45, %v94_v35 }
  0x60   :  { %v108_v48 = vadd.f32 %v106_v47, %v105_v46 }
  0x62   :  { %115 = vst [vmem:[#allocation8] sm:$0xff] %v108_v48 }
  0x63   :  { %204 = shalt.err (!%p201_p6)
}
  0x64   :  { %s205_s10 = scalar_lea.hbm %s279_s2, 128 }
  0x65   :  { %p206_p7 = scmp.ne.s32.totalorder %s279_s2, %s205_s10  ;;  %p209_p8 = scmp.lt.u32.totalorder %s205_s10, %s279_s2 }
  0x67   :  { %p211_p9 = pnand %p209_p8, %p206_p7 }
  0x69   :  { %214 = shalt.err (!%p211_p9)
}
  0x6a   :  { %125 = dma.vmem_to_hbm [thread:$0]  %s123_s6, 128, %s279_s2, [#allocation5]  }
  0x6b   :  { %219 = dma.done.wait [#allocation5], 128  }
  0x6c   :  { %220 = vsyncadd [#allocation5], 4294967168 }
  0x6d   :  { %129 = vsyncpa [#allocation4], 1 }
  0x6e   :  { %130 = vsyncpa [#allocation7], 1 }
  0x6f   :  { %131 = vsyncpa [#allocation5], 1 }

</bundles_post_ra>
